<compile_context>
chip_gen: v6e
topology: v6e:2x2x1
jax: 0.10.0
libtpu: 0.0.40
codegen_flags: <defaults>
</compile_context>

<pallas_src>
import functools

import jax
import jax.numpy as jnp
from jax.experimental import pallas as pl
from jax.experimental.pallas import tpu as pltpu


# ---------------------------------------------------------------------------
# Kernels
# ---------------------------------------------------------------------------

def _se_fused_kernel(x_ref, w1_ref, w2_ref, b1_ref, b2_ref, out_ref, *, inv_hw):
    """Fused pool + FC1/ReLU + FC2/sigmoid + rescale for one (TB, c, hw) block."""
    # Squeeze: per-channel global average (first, independent read of x).
    # Accumulate the spatial sum in f32 regardless of the I/O dtype.
    mean = jnp.sum(x_ref[...].astype(jnp.float32), axis=-1) * inv_hw        # (TB, c)

    # Excitation.  Both FCs are tiny; broadcast-multiply + lane-axis reductions
    # (VPU/XLU), weights in native (out, in) layout.
    # FC1: h1[b, r] = relu(sum_c mean[b, c] * W1[r, c] + b1[r])
    h1 = jnp.sum(mean[:, None, :] * w1_ref[...][None, :, :], axis=-1) + b1_ref[...]
    h1 = jnp.maximum(h1, 0.0)                                               # (TB, cr)
    # FC2: z[b, k] = sum_r h1[b, r] * W2[k, r] + b2[k]
    z = jnp.sum(h1[:, None, :] * w2_ref[...][None, :, :], axis=-1) + b2_ref[...]
    gate = jax.nn.sigmoid(z)                                                # (TB, c)

    # Scale: second, independent read of x; f32 multiply, cast only at store.
    out_ref[...] = (gate[:, :, None] * x_ref[...].astype(jnp.float32)).astype(out_ref.dtype)


def _pool_sum_kernel(x_ref, sum_ref):
    """Two-pass fallback, pass 1: accumulate per-channel spatial sums in f32."""
    @pl.when(pl.program_id(1) == 0)
    def _():
        sum_ref[...] = jnp.zeros_like(sum_ref)
    sum_ref[...] += jnp.sum(x_ref[...].astype(jnp.float32), axis=-1, keepdims=True)


def _scale_kernel(gate_ref, x_ref, out_ref):
    """Two-pass fallback, pass 2: out = gate * x (f32 math, native-dtype store)."""
    out_ref[...] = (gate_ref[...] * x_ref[...].astype(jnp.float32)).astype(out_ref.dtype)


# ---------------------------------------------------------------------------
# Wrapper
# ---------------------------------------------------------------------------

def _vmem_capacity_bytes():
    try:
        return int(pltpu.get_tpu_info().vmem_capacity_bytes)
    except Exception:
        return 64 << 20   # conservative default (v7x per-TensorCore VMEM)


def _round_up(x, m):
    return ((x + m - 1) // m) * m


def _largest_divisor_leq(n, limit):
    limit = max(1, min(n, int(limit)))
    best = 1
    for d in range(1, limit + 1):
        if n % d == 0:
            best = d
    return best


def se_block(x_nchw, w1, b1, w2, b2, *, max_block_bytes=None):
    """SEblock forward.

    x_nchw : (b, c, h, w), any float dtype (kept end-to-end; math in f32)
    w1, b1 : Linear(c -> cr) parameters, shapes (cr, c) and (cr,)
    w2, b2 : Linear(cr -> c) parameters, shapes (c, cr) and (c,)
    """
    b, c, h, w = x_nchw.shape
    hw = h * w
    cr = w1.shape[0]
    itemsize = jnp.dtype(x_nchw.dtype).itemsize

    # Lane-dense spatial layout: flatten h*w, pad to a multiple of 128 with
    # zeros (pooled sum unaffected; padded columns sliced off at the end).
    hw_pad = _round_up(hw, 128)
    x_flat = x_nchw.reshape(b, c, hw)
    if hw_pad != hw:
        x_flat = jnp.pad(x_flat, ((0, 0), (0, 0), (0, hw_pad - hw)))

    # Tiny f32 parameters in native PyTorch (out, in) layout.
    w1f = w1.astype(jnp.float32)                          # (cr, c)
    w2f = w2.astype(jnp.float32)                          # (c, cr)
    b1r = b1.reshape(1, cr).astype(jnp.float32)           # (1, cr)
    b2r = b2.reshape(1, c).astype(jnp.float32)            # (1, c)

    # Generation-aware VMEM budget (v5e/v6e: 128 MiB physical, v7x: 64 MiB).
    phys_vmem = _vmem_capacity_bytes()
    vmem_limit = int(min(phys_vmem // 2, 64 << 20))
    # Target per-step x block ~1-2 MiB; in + out are each double-buffered, so
    # the steady-state footprint is ~4x the block -- well inside the limit.
    block_budget = int(min(vmem_limit // 8, 2 << 20))
    if max_block_bytes is not None:
        block_budget = int(max_block_bytes)
    per_batch_bytes = c * hw_pad * itemsize

    if per_batch_bytes <= block_budget:
        # ------------- Single-pass fused path (x read from HBM once). -------
        tb_cap = max(1, block_budget // per_batch_bytes)
        if b >= 2:
            tb_cap = min(tb_cap, (b + 1) // 2)   # keep >= 2 grid steps (v7x 2 TCs)
        tb = _largest_divisor_leq(b, tb_cap)
        grid = (b // tb,)

        out_flat = pl.pallas_call(
            functools.partial(_se_fused_kernel, inv_hw=1.0 / float(hw)),
            out_shape=jax.ShapeDtypeStruct((b, c, hw_pad), x_flat.dtype),
            grid=grid,
            in_specs=[
                pl.BlockSpec((tb, c, hw_pad), lambda i: (i, 0, 0)),
                pl.BlockSpec((cr, c), lambda i: (0, 0)),
                pl.BlockSpec((c, cr), lambda i: (0, 0)),
                pl.BlockSpec((1, cr), lambda i: (0, 0)),
                pl.BlockSpec((1, c), lambda i: (0, 0)),
            ],
            out_specs=pl.BlockSpec((tb, c, hw_pad), lambda i: (i, 0, 0)),
            compiler_params=pltpu.CompilerParams(
                dimension_semantics=("parallel",),
                vmem_limit_bytes=vmem_limit),
        )(x_flat, w1f, w2f, b1r, b2r)
    else:
        # ------------- Two-pass fallback (slab too big for VMEM). -----------
        # Pass 1: per-channel spatial sums; hw reduction axis last ("arbitrary").
        hwt_cap_elems = max(128, (block_budget // max(1, c * itemsize)) // 128 * 128)
        n_tiles = hw_pad // 128
        hwt = _largest_divisor_leq(n_tiles, hwt_cap_elems // 128) * 128
        grid = (b, hw_pad // hwt)

        sums = pl.pallas_call(
            _pool_sum_kernel,
            out_shape=jax.ShapeDtypeStruct((b, c, 1), jnp.float32),
            grid=grid,
            in_specs=[pl.BlockSpec((None, c, hwt), lambda i, j: (i, 0, j))],
            out_specs=pl.BlockSpec((None, c, 1), lambda i, j: (i, 0, 0)),
            compiler_params=pltpu.CompilerParams(
                dimension_semantics=("parallel", "arbitrary"),
                vmem_limit_bytes=vmem_limit),
        )(x_flat)

        # Tiny excitation FC on (b, c) means: plain JAX -- negligible next to
        # the two passes over x.
        mean = sums[:, :, 0] * (1.0 / float(hw))                       # (b, c)
        h1 = jnp.maximum(mean @ w1f.T + b1r, 0.0)                      # (b, cr)
        gate = jax.nn.sigmoid(h1 @ w2f.T + b2r)                        # (b, c)
        gate3 = gate[:, :, None].astype(jnp.float32)                   # (b, c, 1)

        # Pass 2: apply the gate.
        out_flat = pl.pallas_call(
            _scale_kernel,
            out_shape=jax.ShapeDtypeStruct((b, c, hw_pad), x_flat.dtype),
            grid=grid,
            in_specs=[
                pl.BlockSpec((None, c, 1), lambda i, j: (i, 0, 0)),
                pl.BlockSpec((None, c, hwt), lambda i, j: (i, 0, j)),
            ],
            out_specs=pl.BlockSpec((None, c, hwt), lambda i, j: (i, 0, j)),
            compiler_params=pltpu.CompilerParams(
                dimension_semantics=("parallel", "parallel"),
                vmem_limit_bytes=vmem_limit),
        )(gate3, x_flat)

    if hw_pad != hw:
        out_flat = out_flat[:, :, :hw]
    return out_flat.reshape(b, c, h, w)


def _reference(x, w1, b1, w2, b2):
    """Literal plain-JAX transcription of the PyTorch SEblock.forward (f32 math)."""
    xf = x.astype(jnp.float32)
    branch = jnp.mean(xf, axis=(2, 3))                       # AdaptiveAvgPool2d(1) + view
    h1 = jnp.maximum(branch @ w1.T + b1, 0.0)                # Linear + ReLU
    weight = jax.nn.sigmoid(h1 @ w2.T + b2)                  # Linear + Sigmoid
    return weight[:, :, None, None] * xf                     # reshape (b,c,1,1) * x


if __name__ == "__main__":
    key = jax.random.PRNGKey(0)
    b, c, h, w = 2, 4, 16, 16
    r = 0.5
    cr = int(c * r)

    k_x, k_w1, k_b1, k_w2, k_b2 = jax.random.split(key, 5)
    x = jax.random.normal(k_x, (b, c, h, w), dtype=jnp.float32)
    w1 = 0.5 * jax.random.normal(k_w1, (cr, c), dtype=jnp.float32)
    b1 = 0.1 * jax.random.normal(k_b1, (cr,), dtype=jnp.float32)
    w2 = 0.5 * jax.random.normal(k_w2, (c, cr), dtype=jnp.float32)
    b2 = 0.1 * jax.random.normal(k_b2, (c,), dtype=jnp.float32)

    ref = _reference(x, w1, b1, w2, b2)

    # Single-pass fused path, f32 I/O.
    out = jax.block_until_ready(se_block(x, w1, b1, w2, b2))
    assert out.shape == (b, c, h, w) and out.dtype == x.dtype
    assert jnp.allclose(out, ref, atol=1e-5, rtol=1e-5), "f32 single-pass mismatch"

    # Single-pass fused path, bf16 transport (dtype-polymorphic I/O, f32 math).
    x_bf16 = x.astype(jnp.bfloat16)
    out_bf16 = jax.block_until_ready(se_block(x_bf16, w1, b1, w2, b2))
    ref_bf16 = _reference(x_bf16, w1, b1, w2, b2)
    assert out_bf16.dtype == jnp.bfloat16
    assert jnp.allclose(out_bf16.astype(jnp.float32), ref_bf16, atol=2e-2, rtol=2e-2), \
        "bf16 single-pass mismatch"

    # Two-pass fallback path (forced by shrinking the per-step block budget so
    # the hw-tiled accumulation + separate scale pass are exercised).
    out_tp = jax.block_until_ready(se_block(x, w1, b1, w2, b2, max_block_bytes=1024))
    assert jnp.allclose(out_tp, ref, atol=1e-5, rtol=1e-5), "two-pass fallback mismatch"

    print("KERNEL_OK")
</pallas_src>

<mosaic_0001>
module attributes {stable_mosaic.version = 11 : i64} {
  func.func @_se_fused_kernel(%arg0: i32, %arg1: memref<1x4x256xf32, #tpu.memory_space<vmem>>, %arg2: memref<2x4xf32, #tpu.memory_space<vmem>>, %arg3: memref<4x2xf32, #tpu.memory_space<vmem>>, %arg4: memref<1x2xf32, #tpu.memory_space<vmem>>, %arg5: memref<1x4xf32, #tpu.memory_space<vmem>>, %arg6: memref<1x4x256xf32, #tpu.memory_space<vmem>>) attributes {dimension_semantics = [#tpu.dimension_semantics<parallel>], iteration_bounds = array<i64: 2>, scalar_prefetch = 0 : i64, scratch_operands = 0 : i64, tpu.core_type = #tpu.core_type<tc>, window_params = [{transform_indices = @transform_0, window_bounds = array<i64: 1, 4, 256>}, {pipeline_mode = #tpu.pipeline_mode<synchronous>, transform_indices = @transform_1, window_bounds = array<i64: 2, 4>}, {pipeline_mode = #tpu.pipeline_mode<synchronous>, transform_indices = @transform_2, window_bounds = array<i64: 4, 2>}, {pipeline_mode = #tpu.pipeline_mode<synchronous>, transform_indices = @transform_3, window_bounds = array<i64: 1, 2>}, {pipeline_mode = #tpu.pipeline_mode<synchronous>, transform_indices = @transform_4, window_bounds = array<i64: 1, 4>}, {transform_indices = @transform_5, window_bounds = array<i64: 1, 4, 256>}]} {
    %c0 = arith.constant 0 : index
    %c0_0 = arith.constant 0 : index
    %c0_1 = arith.constant 0 : index
    %0 = vector.load %arg1[%c0, %c0_0, %c0_1] : memref<1x4x256xf32, #tpu.memory_space<vmem>>, vector<1x4x256xf32>
    %cst = arith.constant dense<0.000000e+00> : vector<1x4xf32>
    %1 = vector.multi_reduction <add>, %0, %cst [2] : vector<1x4x256xf32> to vector<1x4xf32>
    %cst_2 = arith.constant 3.906250e-03 : f32
    %2 = vector.broadcast %cst_2 : f32 to vector<1x4xf32>
    %3 = arith.mulf %1, %2 : vector<1x4xf32>
    %4 = vector.shape_cast %3 : vector<1x4xf32> to vector<1x1x4xf32>
    %c0_3 = arith.constant 0 : index
    %c0_4 = arith.constant 0 : index
    %5 = vector.load %arg2[%c0_3, %c0_4] : memref<2x4xf32, #tpu.memory_space<vmem>>, vector<2x4xf32>
    %6 = vector.shape_cast %5 : vector<2x4xf32> to vector<1x2x4xf32>
    %7 = vector.broadcast %4 : vector<1x1x4xf32> to vector<1x2x4xf32>
    %8 = arith.mulf %7, %6 : vector<1x2x4xf32>
    %cst_5 = arith.constant dense<0.000000e+00> : vector<1x2xf32>
    %9 = vector.multi_reduction <add>, %8, %cst_5 [2] : vector<1x2x4xf32> to vector<1x2xf32>
    %c0_6 = arith.constant 0 : index
    %c0_7 = arith.constant 0 : index
    %10 = vector.load %arg4[%c0_6, %c0_7] : memref<1x2xf32, #tpu.memory_space<vmem>>, vector<1x2xf32>
    %11 = arith.addf %9, %10 : vector<1x2xf32>
    %cst_8 = arith.constant 0.000000e+00 : f32
    %12 = vector.broadcast %cst_8 : f32 to vector<1x2xf32>
    %13 = arith.maximumf %11, %12 : vector<1x2xf32>
    %14 = vector.shape_cast %13 : vector<1x2xf32> to vector<1x1x2xf32>
    %c0_9 = arith.constant 0 : index
    %c0_10 = arith.constant 0 : index
    %15 = vector.load %arg3[%c0_9, %c0_10] : memref<4x2xf32, #tpu.memory_space<vmem>>, vector<4x2xf32>
    %16 = vector.shape_cast %15 : vector<4x2xf32> to vector<1x4x2xf32>
    %17 = vector.broadcast %14 : vector<1x1x2xf32> to vector<1x4x2xf32>
    %18 = arith.mulf %17, %16 : vector<1x4x2xf32>
    %cst_11 = arith.constant dense<0.000000e+00> : vector<1x4xf32>
    %19 = vector.multi_reduction <add>, %18, %cst_11 [2] : vector<1x4x2xf32> to vector<1x4xf32>
    %c0_12 = arith.constant 0 : index
    %c0_13 = arith.constant 0 : index
    %20 = vector.load %arg5[%c0_12, %c0_13] : memref<1x4xf32, #tpu.memory_space<vmem>>, vector<1x4xf32>
    %21 = arith.addf %19, %20 : vector<1x4xf32>
    %22 = arith.negf %21 : vector<1x4xf32>
    %23 = math.exp %22 : vector<1x4xf32>
    %cst_14 = arith.constant 1.000000e+00 : f32
    %24 = vector.broadcast %cst_14 : f32 to vector<1x4xf32>
    %25 = arith.addf %24, %23 : vector<1x4xf32>
    %26 = arith.divf %24, %25 : vector<1x4xf32>
    %27 = vector.shape_cast %26 : vector<1x4xf32> to vector<1x4x1xf32>
    %c0_15 = arith.constant 0 : index
    %c0_16 = arith.constant 0 : index
    %c0_17 = arith.constant 0 : index
    %28 = vector.load %arg1[%c0_15, %c0_16, %c0_17] : memref<1x4x256xf32, #tpu.memory_space<vmem>>, vector<1x4x256xf32>
    %29 = vector.broadcast %27 : vector<1x4x1xf32> to vector<1x4x256xf32>
    %30 = arith.mulf %29, %28 : vector<1x4x256xf32>
    %c0_18 = arith.constant 0 : index
    %c0_19 = arith.constant 0 : index
    %c0_20 = arith.constant 0 : index
    %31 = vector.load %arg6[%c0_18, %c0_19, %c0_20] : memref<1x4x256xf32, #tpu.memory_space<vmem>>, vector<1x4x256xf32>
    tpu.vector_store %arg6[%c0_18, %c0_19, %c0_20], %30 {strides = array<i32>} : memref<1x4x256xf32, #tpu.memory_space<vmem>>, vector<1x4x256xf32>,
    return
  }
  func.func @transform_0(%arg0: i32) -> (i32, i32, i32) {
    %c0_i32 = arith.constant 0 : i32
    %c0_i32_0 = arith.constant 0 : i32
    %c0_i32_1 = arith.constant 0 : i32
    return %arg0, %c0_i32, %c0_i32_0 : i32, i32, i32
  }
  func.func @transform_1(%arg0: i32) -> (i32, i32) {
    %c0_i32 = arith.constant 0 : i32
    %c0_i32_0 = arith.constant 0 : i32
    %c0_i32_1 = arith.constant 0 : i32
    return %c0_i32, %c0_i32_0 : i32, i32
  }
  func.func @transform_2(%arg0: i32) -> (i32, i32) {
    %c0_i32 = arith.constant 0 : i32
    %c0_i32_0 = arith.constant 0 : i32
    %c0_i32_1 = arith.constant 0 : i32
    return %c0_i32, %c0_i32_0 : i32, i32
  }
  func.func @transform_3(%arg0: i32) -> (i32, i32) {
    %c0_i32 = arith.constant 0 : i32
    %c0_i32_0 = arith.constant 0 : i32
    %c0_i32_1 = arith.constant 0 : i32
    return %c0_i32, %c0_i32_0 : i32, i32
  }
  func.func @transform_4(%arg0: i32) -> (i32, i32) {
    %c0_i32 = arith.constant 0 : i32
    %c0_i32_0 = arith.constant 0 : i32
    %c0_i32_1 = arith.constant 0 : i32
    return %c0_i32, %c0_i32_0 : i32, i32
  }
  func.func @transform_5(%arg0: i32) -> (i32, i32, i32) {
    %c0_i32 = arith.constant 0 : i32
    %c0_i32_0 = arith.constant 0 : i32
    %c0_i32_1 = arith.constant 0 : i32
    return %arg0, %c0_i32, %c0_i32_0 : i32, i32, i32
  }
}

</mosaic_0001>

<bundles_post_ra>
// kernel: tpu_custom_call.1
= control target key start
LH: loop header
LB: loop body
LE: loop exit
PB: predicated region body
PF: predicated region fallthrough
CT: control target
= control target key end

     0   :  { %10 = vsyncpa [#allocation3], 0  ;;  %s872_s0 = inlined_call_operand.hbm [shape: f32[2,4,256], index: 0, kind: input, shape index: {}]   ;;  %s873_s1 = inlined_call_operand.vmem [shape: f32[2,4], index: 1, kind: input, shape index: {}]   ;;  %s874_s2 = inlined_call_operand.vmem [shape: f32[4,2], index: 2, kind: input, shape index: {}]   ;;  %s875_s3 = inlined_call_operand.vmem [shape: f32[1,2], index: 3, kind: input, shape index: {}]   ;;  %s876_s4 = inlined_call_operand.vmem [shape: f32[1,4], index: 4, kind: input, shape index: {}]   ;;  %s877_s5 = inlined_call_operand.hbm [shape: f32[2,4,256], index: 5, kind: output, shape index: {}]  }
   0x1   :  { %12 = vsyncpa [#allocation3 + $0x1], 0 }
   0x2   :  { %13 = vsyncpa [#allocation4], 0 }
   0x3   :  { %15 = vsyncpa [#allocation4 + $0x1], 0  ;;  %s703_s18 = smov 0   ;;  %s705_s19 = smov 0  }
   0x4   :  { %s707_s20 = smov 0   ;;  %s709_s21 = smov 0  }
   0x5 LB: > { %s724_s22 = sadd.s32 4294967295, %s668_s21   ;;  %s503_s23 = sadd.s32 4294967294, %s668_s21   ;;  %s668_s21 = sphi %s709_s21, %s894_s21   ;;  %s664_s20 = sphi %s707_s20, %s893_s20   ;;  %s660_s19 = sphi %s705_s19, %s892_s19   ;;  %s656_s18 = sphi %s703_s18, %s891_s18  }
   0x6   : > { %s728_s24 = sadd.s32 1, %s668_s21   ;;  %s28_s25 = sadd.s32 1, %s664_s20 }
   0x7   : > { %s25_s26 = ssub.s32 %s668_s21, %s728_s24  ;;  %p35_p0 = scmp.ne.s32.totalorder %s664_s20, %s660_s19 }
   0x8   : > { %p26_p1 = scmp.eq.s32.totalorder %s25_s26, 0  ;;  %p36_p2 = scmp.eq.s32.totalorder %s668_s21, 0 }
   0x9   : > { %p41_p3 = scmp.ne.s32.totalorder %s660_s19, %s656_s18  ;;  %p42_p4 = scmp.eq.s32.totalorder %s724_s22, 0 }
   0xa   : > { %s740_s27 = scalar_select %p26_p1, %s664_s20, %s28_s25  }
   0xb   : > { %p742_p5 = por %p36_p2, %p35_p0  ;;  %p746_p6 = por %p42_p4, %p41_p3 }
   0xc   : > { %p149_p7 = scmp.eq.s32.totalorder %s724_s22, 1  ;;  %p155_p8 = scmp.eq.s32.totalorder %s503_s23, 1 }
   0xd   : > { %s881_s29 = scalar_select %p746_p6, 1, 0 }
   0xe   : > { %p534_p10 = scmp.lt.s32.totalorder %s668_s21, 2  ;;  %p753_p11 = por %p149_p7, %p35_p0 }
   0xf   : > { %p757_p12 = por %p155_p8, %p41_p3  ;;  %s187_s7 = sand.u32 1, %s664_s20  }
  0x10   : > { %s882_s30 = scalar_select %p753_p11, 1, 0 }
  0x11   : > { %s883_s6 = scalar_select %p757_p12, 1, 0 }
  0x12   : > { %s520_s8 = sshll.u32 %s668_s21, 7  ;;  %s506_s9 = sshll.u32 %s187_s7, 3 }
  0x13   : > { %s766_s12 = scalar_lea.hbm %s872_s0, %s520_s8  ;;  %s191_s13 = scalar_lea.vmem [#allocation2], %s506_s9 }
  0x14   : > { %s199_s14 = sshll.u32 %s191_s13, 4  ;;  %p770_p13 = pnand %p534_p10, %p742_p5  ;;  %s774_s14 = int_to_ptr.vmem [resolvable:$true] %s199_s14 }
  0x15   : > { %s188_s16 = scalar_lea.sflag [#allocation3], %s187_s7  ;;  %s576_s17 = scalar_lea.hbm %s766_s12, 128 }
  0x16   : > { %p577_p2 = scmp.ne.s32.totalorder %s766_s12, %s576_s17  ;;  %p578_p3 = pneg %p770_p13 }
  0x17   : > { %s581_s26 = scalar_lea.hbm %s872_s0, 256  ;;  %p582_p5 = scmp.lt.s32.totalorder %s766_s12, %s872_s0 }
  0x18   : > { %p579_p4 = pnand %p578_p3, %p577_p2  ;;  %p583_p8 = scmp.lt.s32.totalorder %s581_s26, %s576_s17 }
  0x1a   : > { %p580_p7 = pneg %p579_p4  ;;  %p584_p10 = por %p583_p8, %p582_p5 }
  0x1c   : > { %p585_p9 = pnand %p584_p10, %p580_p7 }
  0x1e   : > { %588 = shalt.err (!%p585_p9)
}
  0x1f   : > { %s589_s7 = scalar_lea.vmem %s774_s14, 128  ;;  %s670_s9 = smov [#allocation2]  }
  0x20   : > { %p590_p0 = scmp.ne.s32.totalorder %s774_s14, %s589_s7  ;;  %s594_s10 = sshll.u32 %s670_s9, 4  ;;  %s595_s10 = int_to_ptr.vmem [resolvable:$false] %s594_s10 }
  0x21   : > { %s596_s11 = scalar_lea.vmem %s595_s10, 256  ;;  %p597_p4 = scmp.lt.s32.totalorder %s774_s14, %s595_s10 }
  0x22   : > { %p592_p1 = pnand %p590_p0, %p578_p3  ;;  %p598_p12 = scmp.lt.s32.totalorder %s596_s11, %s589_s7 }
  0x24   : > { %p593_p2 = pneg %p592_p1  ;;  %p599_p11 = por %p598_p12, %p597_p4 }
  0x26   : > { %p600_p6 = pnand %p599_p11, %p593_p2 }
  0x28   : > { %603 = shalt.err (!%p600_p6)
}
  0x29   : > { %529 = dma.hbm_to_vmem [thread:$0]  (!%p770_p13), %s766_s12, 128, %s774_s14, %s188_s16  }
  0x2a   : > { %p885_p9 = scmp.lt.s32.totalorder %s668_s21, 3  ;;  %p886_p7 = scmp.ge.s32.totalorder %s668_s21, 1 }
  0x2c   : > { %p205_p0 = pnand %p886_p7, %p885_p9 }
  0x2d   : > { %s801_s13 = sand.u32 (!%p205_p0), 1, %s660_s19   ;;  %p887_p6 = scmp.ne.s32.totalorder (!%p205_p0), %s881_s29, 0 }
  0x2e   : > { %208 = sbr.rel (%p205_p0) target bundleno = 927 (0x39f), region = 40  ;;  %s510_s17 = sshll.u32 (!%p205_p0), %s801_s13, 3 }
  0x2f   : > { %s211_s23 = scalar_lea.sflag (!%p205_p0), [#allocation3], %s801_s13  ;;  %s214_s15 = scalar_lea.vmem (!%p205_p0), [#allocation2], %s510_s17 }
  0x33   : > { %647 = dma.done.wait (%p887_p6), %s211_s23, 128  }
  0x34   : > { %649 = vsyncadd (%p887_p6), %s211_s23, 4294967168  ;;  %v254_v0 = vlaneseq  ;;  %vm245_vm0 = vcmask 1043456   ;;  %v811_v3 = vld [vmem:[%s214_s15] sm:$0xff]  ;;  %v671_v11 = vmov 0   ;;  %vm290_vm1 = vcmask 1041409   ;;  %s521_s7 = sshll.u32 %s724_s22, 7 }
  0x35   : > { %v252_v4 = vld [vmem:[%s873_s1] sm:$0x3]  ;;  %v818_v5 = vcombine.high %v811_v3, %v811_v3  ;;  %v246_v6 = vsel %vm245_vm0, %v811_v3, 0.0  ;;  %569 = vset.pattern.permute.xlu1 %v671_v11  ;;  %570 = vset.pattern.permute.xlu0 %v671_v11  ;;  %vm293_vm2 = vcmask 25600   ;;  %vm380_vm3 = vcmask 1042434   ;;  %s240_s9 = scalar_lea.vmem [#allocation5], %s510_s17  ;;  %s431_s15 = scalar_lea.hbm %s877_s5, %s521_s7 }
  0x36   : > { %v255_v1 = vshrl.u32 %v254_v0, 7  ;;  %v512_v19 = vld [vmem:[%s875_s3] ss:$0 sm:$0xff]  ;;  %v281_v27 = vand.u32 127, %v254_v0  ;;  %vm382_vm4 = vcmask 1043459   ;;  %vm385_vm5 = vcmask 11264  }
  0x37   : > { %v247_v8 = vsel %vm245_vm0, %v818_v5, 0.0  ;;  %v309_v20 = vld [vmem:[%s874_s2] sm:$0xf]  ;;  %s433_s10 = sshll.u32 %s240_s9, 4  ;;  %s419_s12 = scalar_lea.sflag [#allocation4], %s801_s13  ;;  %s434_s10 = int_to_ptr.vmem [resolvable:$true] %s433_s10 }
  0x38   : > { %v263_v2 = vsub.s32 1, %v255_v1  ;;  %v248_v9 = vadd.f32 %v247_v8, %v246_v6  ;;  %v256_v10 = vsub.s32 0, %v255_v1  ;;  %v327_v23 = vsub.s32 2, %v255_v1  ;;  %v513_v47 = vld [vmem:[%s876_s4] ss:$0 sm:$0xff]  ;;  %s604_s14 = scalar_lea.vmem %s434_s10, 128 }
  0x39   : > { %v334_v25 = vsub.s32 3, %v255_v1  ;;  %v284_v29 = vsub.s32 %v281_v27, %v255_v1  ;;  %p605_p11 = scmp.ne.s32.totalorder %s434_s10, %s604_s14  ;;  %p888_p12 = scmp.ne.s32.totalorder %s882_s30, 0 }
  0x3a   : > { %v264_v7 = vrot.slane %v252_v4, %v263_v2  ;;  %249 = vadd.xlane.f32.xlu0 %v248_v9  ;;  %v257_v12 = vrot.slane %v252_v4, %v256_v10  ;;  %v314_v21 = vrot.slane %v309_v20, %v256_v10  ;;  %v321_v22 = vrot.slane %v309_v20, %v263_v2  ;;  %s672_s22 = smov [#allocation5]  }
  0x3b   : > { %v328_v24 = vrot.slane %v309_v20, %v327_v23  ;;  %v335_v26 = vrot.slane %v309_v20, %v334_v25  ;;  %p606_p13 = pnand %p605_p11, %p888_p12  ;;  %s608_s17 = sshll.u32 %s672_s22, 4  ;;  %s609_s17 = int_to_ptr.vmem [resolvable:$false] %s608_s17 }
  0x3c   : > { %266 = vbcast.lane.b32.xlu1 %v264_v7, 256  ;;  %s610_s29 = scalar_lea.vmem %s609_s17, 256  ;;  %p611_p3 = scmp.lt.s32.totalorder %s434_s10, %s609_s17 }
  0x3d   : > { %p607_p1 = pneg %p606_p13  ;;  %p612_p5 = scmp.lt.s32.totalorder %s610_s29, %s604_s14 }
  0x3f   : > { %p613_p8 = por %p612_p5, %p611_p3 }
  0x41   : > { %p614_p10 = pnand %p613_p8, %p607_p1 }
  0x50   : > { %259 = vbcast.lane.b32.xlu0 %v257_v12, 256 }
  0x54   : > { %304 = vbcast.lane.b32.xlu0 %v512_v19, 256 }
  0x58   : > { %316 = vbcast.lane.b32.xlu0 %v314_v21, 256 }
  0x5c   : > { %323 = vbcast.lane.b32.xlu0 %v321_v22, 256 }
  0x60   : > { %330 = vbcast.lane.b32.xlu0 %v328_v24, 256 }
  0x64   : > { %337 = vbcast.lane.b32.xlu0 %v335_v26, 256 }
  0xae   : > { %v267_v17 = vpop.permute.xlu1 %266 }
  0xc3   : > { %v250_v13 = vpop.xlane.xlu0 %249 }
  0xc4   : > { %v251_v14 = vmul.f32 0.00390625, %v250_v13 }
  0xc6   : > { %v271_v18 = vmul.f32 %v267_v17, %v251_v14 }
  0xc7   : > { %v260_v15 = vpop.permute.xlu0 %259 }
  0xc8   : > { %v270_v16 = vmul.f32 %v260_v15, %v251_v14 }
  0xca   : > { %275 = vperm.xlu1 %569, %v270_v16  }
  0xcb   : > { %v305_v35 = vpop.permute.xlu0 %304 }
  0xce   : > { %278 = vperm.xlu1 %569, %v271_v18  }
  0xcf   : > { %v317_v36 = vpop.permute.xlu0 %316 }
  0xd3   : > { %v324_v37 = vpop.permute.xlu0 %323 }
  0xd7   : > { %v331_v41 = vpop.permute.xlu0 %330 }
  0xdb   : > { %v338_v45 = vpop.permute.xlu0 %337 }
 0x145   : > { %v276_v28 = vpop.permute.xlu1 %275 }
 0x146   : > { %v285_v31 = vrot.slane %v276_v28, %v284_v29 }
 0x149   : > { %v279_v30 = vpop.permute.xlu1 %278 }
 0x14a   : > { %v289_v32 = vrot.slane %v279_v30, %v284_v29 }
 0x14c   : > { %v291_v33 = vsel %vm290_vm1, %v289_v32, %v285_v31 }
 0x14d   : > { %v294_v34 = vsel %vm293_vm2, %v291_v33, 0.0 }
 0x14e   : > { %295 = vadd.xlane.f32.xlu1 %v294_v34 }
 0x1d7   : > { %v296_v38 = vpop.xlane.xlu1 %295 }
 0x1d8   : > { %v307_v39 = vadd.f32 %v305_v35, %v296_v38 }
 0x1da   : > { %v308_v40 = vmax.f32 %v307_v39, 0.0 }
 0x1dc   : > { %v343_v42 = vmul.f32 %v317_v36, %v308_v40  ;;  %v344_v43 = vmul.f32 %v324_v37, %v308_v40  ;;  %v345_v44 = vmul.f32 %v331_v41, %v308_v40  ;;  %v346_v46 = vmul.f32 %v338_v45, %v308_v40 }
 0x1de   : > { %352 = vperm.xlu0 %570, %v343_v42   ;;  %355 = vperm.xlu1 %569, %v344_v43  }
 0x1e2   : > { %358 = vperm.xlu0 %570, %v345_v44   ;;  %396 = vbcast.lane.b32.xlu1 %v513_v47, 256 }
 0x1e6   : > { %361 = vperm.xlu0 %570, %v346_v46  }
 0x259   : > { %v353_v48 = vpop.permute.xlu0 %352  ;;  %v356_v49 = vpop.permute.xlu1 %355 }
 0x25a   : > { %v370_v51 = vrot.slane %v356_v49, %v284_v29  ;;  %v366_v52 = vrot.slane %v353_v48, %v284_v29 }
 0x25c   : > { %v379_v55 = vsel %vm290_vm1, %v370_v51, %v366_v52 }
 0x25d   : > { %v359_v50 = vpop.permute.xlu0 %358  ;;  %v397_v60 = vpop.permute.xlu1 %396 }
 0x25e   : > { %v374_v53 = vrot.slane %v359_v50, %v284_v29 }
 0x260   : > { %v381_v57 = vsel %vm380_vm3, %v374_v53, %v379_v55 }
 0x261   : > { %v362_v54 = vpop.permute.xlu0 %361 }
 0x262   : > { %v378_v56 = vrot.slane %v362_v54, %v284_v29 }
 0x264   : > { %v383_v58 = vsel %vm382_vm4, %v378_v56, %v381_v57 }
 0x265   : > { %v386_v59 = vsel %vm385_vm5, %v383_v58, 0.0 }
 0x266   : > { %387 = vadd.xlane.f32.xlu0 %v386_v59 }
 0x2ef   : > { %v388_v61 = vpop.xlane.xlu0 %387 }
 0x2f0   : > { %v399_v62 = vadd.f32 %v397_v60, %v388_v61 }
 0x2f2   : > { %v514_v63 = vmul.f32 -1.442695, %v399_v62 }
 0x2f4   : > { %572 = vpow2.f32 %v514_v63 }
 0x301   : > { %v573_v0 = vpop.eup %572 }
 0x302   : > { %v403_v1 = vadd.f32 1.0, %v573_v0 }
 0x304   : > { %574 = vrcp.f32 %v403_v1 }
 0x311   : > { %v575_v2 = vpop.eup %574 }
 0x312   : > { %408 = vperm.xlu1 %569, %v575_v2  }
 0x38d   : > { %v409_v4 = vpop.permute.xlu1 %408 }
 0x38e   : > { %v411_v6 = vmul.f32 %v409_v4, %v811_v3  ;;  %v412_v7 = vmul.f32 %v409_v4, %v818_v5 }
 0x390   : > { %v415_v8 = vcombine.low %v411_v6, %v412_v7 }
 0x392   : > { %417 = vst [vmem:[%s240_s9] sm:$0xff] %v415_v8 }
 0x393   : > { %617 = shalt.err (!%p614_p10)
}
 0x394   : > { %s618_s16 = scalar_lea.hbm %s431_s15, 128  ;;  %s622_s26 = scalar_lea.hbm %s877_s5, 256 }
 0x395   : > { %p619_p2 = scmp.ne.s32.totalorder %s431_s15, %s618_s16  ;;  %p623_p7 = scmp.lt.s32.totalorder %s431_s15, %s877_s5 }
 0x396   : > { %p624_p0 = scmp.lt.s32.totalorder %s622_s26, %s618_s16 }
 0x397   : > { %p620_p4 = pnand %p619_p2, %p888_p12 }
 0x398   : > { %p625_p6 = por %p624_p0, %p623_p7 }
 0x399   : > { %p621_p9 = pneg %p620_p4 }
 0x39b   : > { %p626_p11 = pnand %p625_p6, %p621_p9 }
 0x39d   : > { %629 = shalt.err (!%p626_p11)
}
 0x39e   : > { %524 = dma.vmem_to_hbm [thread:$0]  (%p888_p12), %s434_s10, 128, %s431_s15, %s419_s12  }
 0x39f PF: > { %s445_s7 = sand.u32 1, %s656_s18   ;;  %p889_p13 = scmp.ne.s32.totalorder %s883_s6, 0 }
 0x3a0   : > { %p890_p1 = scmp.ge.s32.totalorder %s668_s21, 2  ;;  %s446_s9 = scalar_lea.sflag [#allocation4], %s445_s7 }
 0x3a2   : > { %p531_p3 = pnand %p890_p1, %p889_p13 }
 0x3a4   : > { %p532_p5 = pneg %p531_p3 }
 0x3a6   : > { %651 = dma.done.wait (%p532_p5), %s446_s9, 128  }
 0x3a7   : > { %653 = vsyncadd (%p532_p5), %s446_s9, 4294967168  ;;  %p18_p8 = scmp.ge.s32.totalorder %s728_s24, 4   ;;  %s891_s18 = smov %s660_s19 }
 0x3a8   : > { %s892_s19 = smov %s664_s20  ;;  %s893_s20 = smov %s740_s27 }
 0x3a9   : > { %s894_s21 = smov %s728_s24  ;;  %20 = sbr.rel (!%p18_p8) target bundleno = 5 (0x5), region = 85 }
 0x3ae   :  { %451 = vsyncpa [#allocation3], 1 }
 0x3af   :  { %453 = vsyncpa [#allocation3 + $0x1], 1 }
 0x3b0   :  { %454 = vsyncpa [#allocation4], 1 }
 0x3b1   :  { %456 = vsyncpa [#allocation4 + $0x1], 1 }

</bundles_post_ra>
